<compile_context>
chip_gen: v7x
topology: tpu7x:2x2x1
jax: 0.10.0
libtpu: 0.0.40
codegen_flags: <defaults>
</compile_context>

<pallas_src>
import functools

import jax
import jax.numpy as jnp
from jax.experimental import pallas as pl
from jax.experimental.pallas import tpu as pltpu

SUBLANE = 8


def _round_up(x, m):
    return ((x + m - 1) // m) * m


def _cdiv(a, b):
    return (a + b - 1) // b


def mlp_kernel(x_ref, w1_ref, b1_ref, w2_ref, b2_ref, o_ref, *, negative_slope):
    # Hidden layer: (TB, ndIn) @ (ndIn, H) + (1, H)
    h = jnp.dot(x_ref[...], w1_ref[...], preferred_element_type=jnp.float32)
    h = h + b1_ref[...]
    # LeakyReLU(negative_slope=0.3) -- matches nn.LeakyReLU(0.3).
    h = jnp.where(h > 0, h, negative_slope * h)
    # Output layer: (TB, H) @ (H, ndOut) + (1, ndOut) -- unpadded store.
    y = jnp.dot(h, w2_ref[...], preferred_element_type=jnp.float32)
    o_ref[...] = (y + b2_ref[...]).astype(o_ref.dtype)


def _forward_pallas(x, w1, b1, w2, b2, *, block_rows, negative_slope):
    B, ndIn = x.shape
    H = w1.shape[1]
    ndOut = w2.shape[1]

    # --- Adaptive batch tiling ----------------------------------------------
    # * at least 2 tiles whenever B > SUBLANE (feeds both v7x TensorCores),
    # * TB capped at block_rows (default 4096),
    # * padding waste capped at < one tile (adaptive TB, not fixed TB).
    n_tiles = max(_cdiv(B, block_rows), min(2, _cdiv(B, SUBLANE)))
    TB = _round_up(_cdiv(B, n_tiles), SUBLANE)
    B_p = _round_up(B, TB)
    if B_p != B:
        x = jnp.pad(x, ((0, B_p - B), (0, 0)))

    grid = (B_p // TB,)

    cost = pl.CostEstimate(
        flops=2 * B_p * (ndIn * H + H * ndOut),
        transcendentals=0,
        bytes_accessed=4 * (B_p * ndIn + ndIn * H + H + H * ndOut + ndOut
                            + B_p * ndOut),
    )

    out_padded = pl.pallas_call(
        functools.partial(mlp_kernel, negative_slope=negative_slope),
        out_shape=jax.ShapeDtypeStruct((B_p, ndOut), jnp.float32),
        grid=grid,
        in_specs=[
            # Streamed over the batch axis.
            pl.BlockSpec((TB, ndIn), lambda i: (i, 0)),
            # Small weights/biases: resident full blocks, DMA'd once.
            pl.BlockSpec((ndIn, H), lambda i: (0, 0)),
            pl.BlockSpec((1, H), lambda i: (0, 0)),
            pl.BlockSpec((H, ndOut), lambda i: (0, 0)),
            pl.BlockSpec((1, ndOut), lambda i: (0, 0)),
        ],
        # Last dim == full array dim (ndOut), so no lane padding needed.
        out_specs=pl.BlockSpec((TB, ndOut), lambda i: (i, 0)),
        compiler_params=pltpu.CompilerParams(
            dimension_semantics=("parallel",),  # shard batch tiles across TCs (v7x)
        ),
        cost_estimate=cost,
    )(x, w1, b1, w2, b2)

    # Only batch padding (if any) remains to slice away.
    return out_padded[:B] if B_p != B else out_padded


def neural_network_forward(x, w1, b1, w2, b2, *, block_rows=4096,
                           negative_slope=0.3, min_pallas_batch=1024):
    """Forward of NeuralNetwork(inputDim, outputDim, numNeurons).

    x : (B, ndIn) float32
    w1: (ndIn, H)    -- transpose of torch Linear.weight
    b1: (1, H)
    w2: (H, ndOut)   -- transpose of torch Linear.weight
    b2: (1, ndOut)
    returns (B, ndOut) float32
    """
    B = x.shape[0]
    if B < min_pallas_batch:
        # Tiny problems: pallas_call fixed cost dwarfs the work; a fused XLA
        # dot-bias-dot is strictly faster here.
        h = x @ w1 + b1
        h = jnp.where(h > 0, h, negative_slope * h)
        return h @ w2 + b2
    return _forward_pallas(x, w1, b1, w2, b2, block_rows=block_rows,
                           negative_slope=negative_slope)


def _reference(x, w1, b1, w2, b2, negative_slope=0.3):
    h = x @ w1 + b1
    h = jnp.where(h > 0, h, negative_slope * h)
    return h @ w2 + b2


if __name__ == "__main__":
    # Module hyperparameters (small, consistent with the forward pass):
    inputDim, outputDim, numNeurons = 16, 8, 32

    key = jax.random.PRNGKey(0)
    k_x, k_w1, k_b1, k_w2, k_b2, k_x2 = jax.random.split(key, 6)

    # Deterministic parameter init (mimicking torch.nn.Linear uniform bounds).
    bound1 = 1.0 / (inputDim ** 0.5)
    w1 = jax.random.uniform(k_w1, (inputDim, numNeurons), jnp.float32, -bound1, bound1)
    b1 = jax.random.uniform(k_b1, (1, numNeurons), jnp.float32, -bound1, bound1)
    bound2 = 1.0 / (numNeurons ** 0.5)
    w2 = jax.random.uniform(k_w2, (numNeurons, outputDim), jnp.float32, -bound2, bound2)
    b2 = jax.random.uniform(k_b2, (1, outputDim), jnp.float32, -bound2, bound2)

    # 1) Small batch, forced through the Pallas kernel (single grid step).
    batch = 8
    x = jax.random.normal(k_x, (batch, inputDim), dtype=jnp.float32)
    out = neural_network_forward(x, w1, b1, w2, b2, min_pallas_batch=0)
    jax.block_until_ready(out)
    ref = _reference(x, w1, b1, w2, b2)
    assert out.shape == (batch, outputDim)
    assert jnp.allclose(out, ref, atol=1e-5, rtol=1e-5)

    # 2) Batch that exercises adaptive tiling + 2 grid tiles + tail padding.
    batch2 = 33
    x2 = jax.random.normal(k_x2, (batch2, inputDim), dtype=jnp.float32)
    out2 = neural_network_forward(x2, w1, b1, w2, b2, min_pallas_batch=0)
    jax.block_until_ready(out2)
    ref2 = _reference(x2, w1, b1, w2, b2)
    assert out2.shape == (batch2, outputDim)
    assert jnp.allclose(out2, ref2, atol=1e-5, rtol=1e-5)

    # TODO(synk): if many such tiny MLPs exist (per-head/per-expert), stack them
    # into one lane-dense GEMM (ndIn, H*n_heads) instead of separate calls; and
    # consider bf16 streaming of x/w on v6e/v7x if the accuracy budget allows.
    print("KERNEL_OK")
</pallas_src>

<mosaic_0001>
module attributes {stable_mosaic.version = 11 : i64} {
  func.func @mlp_kernel(%arg0: i32, %arg1: memref<8x16xf32, #tpu.memory_space<vmem>>, %arg2: memref<16x32xf32, #tpu.memory_space<vmem>>, %arg3: memref<1x32xf32, #tpu.memory_space<vmem>>, %arg4: memref<32x8xf32, #tpu.memory_space<vmem>>, %arg5: memref<1x8xf32, #tpu.memory_space<vmem>>, %arg6: memref<8x8xf32, #tpu.memory_space<vmem>>) attributes {dimension_semantics = [#tpu.dimension_semantics<parallel>], iteration_bounds = array<i64: 1>, scalar_prefetch = 0 : i64, scratch_operands = 0 : i64, tpu.core_type = #tpu.core_type<tc>, window_params = [{transform_indices = @transform_0, window_bounds = array<i64: 8, 16>}, {pipeline_mode = #tpu.pipeline_mode<synchronous>, transform_indices = @transform_1, window_bounds = array<i64: 16, 32>}, {pipeline_mode = #tpu.pipeline_mode<synchronous>, transform_indices = @transform_2, window_bounds = array<i64: 1, 32>}, {pipeline_mode = #tpu.pipeline_mode<synchronous>, transform_indices = @transform_3, window_bounds = array<i64: 32, 8>}, {pipeline_mode = #tpu.pipeline_mode<synchronous>, transform_indices = @transform_4, window_bounds = array<i64: 1, 8>}, {transform_indices = @transform_5, window_bounds = array<i64: 8, 8>}]} {
    %c0 = arith.constant 0 : index
    %c0_0 = arith.constant 0 : index
    %0 = vector.load %arg1[%c0, %c0_0] : memref<8x16xf32, #tpu.memory_space<vmem>>, vector<8x16xf32>
    %c0_1 = arith.constant 0 : index
    %c0_2 = arith.constant 0 : index
    %1 = vector.load %arg2[%c0_1, %c0_2] : memref<16x32xf32, #tpu.memory_space<vmem>>, vector<16x32xf32>
    %cst = arith.constant dense<0.000000e+00> : vector<8x32xf32>
    %2 = tpu.matmul %0, %1, %cst {dimension_numbers = #tpu.dot_dimension_numbers<[1], [0], [0], [1], [0, 0, 1, 1], [], []>} : vector<8x16xf32>, vector<16x32xf32>, vector<8x32xf32> -> vector<8x32xf32>
    %c0_3 = arith.constant 0 : index
    %c0_4 = arith.constant 0 : index
    %3 = vector.load %arg3[%c0_3, %c0_4] : memref<1x32xf32, #tpu.memory_space<vmem>>, vector<1x32xf32>
    %4 = vector.broadcast %3 : vector<1x32xf32> to vector<8x32xf32>
    %5 = arith.addf %2, %4 : vector<8x32xf32>
    %cst_5 = arith.constant 0.000000e+00 : f32
    %6 = vector.broadcast %cst_5 : f32 to vector<8x32xf32>
    %7 = arith.cmpf ogt, %5, %6 : vector<8x32xf32>
    %cst_6 = arith.constant 3.000000e-01 : f32
    %8 = vector.broadcast %cst_6 : f32 to vector<8x32xf32>
    %9 = arith.mulf %8, %5 : vector<8x32xf32>
    %10 = arith.select %7, %5, %9 : vector<8x32xi1>, vector<8x32xf32>
    %c0_7 = arith.constant 0 : index
    %c0_8 = arith.constant 0 : index
    %11 = vector.load %arg4[%c0_7, %c0_8] : memref<32x8xf32, #tpu.memory_space<vmem>>, vector<32x8xf32>
    %cst_9 = arith.constant dense<0.000000e+00> : vector<8x8xf32>
    %12 = tpu.matmul %10, %11, %cst_9 {dimension_numbers = #tpu.dot_dimension_numbers<[1], [0], [0], [1], [0, 0, 1, 1], [], []>} : vector<8x32xf32>, vector<32x8xf32>, vector<8x8xf32> -> vector<8x8xf32>
    %c0_10 = arith.constant 0 : index
    %c0_11 = arith.constant 0 : index
    %13 = vector.load %arg5[%c0_10, %c0_11] : memref<1x8xf32, #tpu.memory_space<vmem>>, vector<1x8xf32>
    %14 = vector.broadcast %13 : vector<1x8xf32> to vector<8x8xf32>
    %15 = arith.addf %12, %14 : vector<8x8xf32>
    %c0_12 = arith.constant 0 : index
    %c0_13 = arith.constant 0 : index
    %16 = vector.load %arg6[%c0_12, %c0_13] : memref<8x8xf32, #tpu.memory_space<vmem>>, vector<8x8xf32>
    tpu.vector_store %arg6[%c0_12, %c0_13], %15 {strides = array<i32>} : memref<8x8xf32, #tpu.memory_space<vmem>>, vector<8x8xf32>,
    return
  }
  func.func @transform_0(%arg0: i32) -> (i32, i32) {
    %c0_i32 = arith.constant 0 : i32
    %c0_i32_0 = arith.constant 0 : i32
    return %arg0, %c0_i32 : i32, i32
  }
  func.func @transform_1(%arg0: i32) -> (i32, i32) {
    %c0_i32 = arith.constant 0 : i32
    %c0_i32_0 = arith.constant 0 : i32
    %c0_i32_1 = arith.constant 0 : i32
    return %c0_i32, %c0_i32_0 : i32, i32
  }
  func.func @transform_2(%arg0: i32) -> (i32, i32) {
    %c0_i32 = arith.constant 0 : i32
    %c0_i32_0 = arith.constant 0 : i32
    %c0_i32_1 = arith.constant 0 : i32
    return %c0_i32, %c0_i32_0 : i32, i32
  }
  func.func @transform_3(%arg0: i32) -> (i32, i32) {
    %c0_i32 = arith.constant 0 : i32
    %c0_i32_0 = arith.constant 0 : i32
    %c0_i32_1 = arith.constant 0 : i32
    return %c0_i32, %c0_i32_0 : i32, i32
  }
  func.func @transform_4(%arg0: i32) -> (i32, i32) {
    %c0_i32 = arith.constant 0 : i32
    %c0_i32_0 = arith.constant 0 : i32
    %c0_i32_1 = arith.constant 0 : i32
    return %c0_i32, %c0_i32_0 : i32, i32
  }
  func.func @transform_5(%arg0: i32) -> (i32, i32) {
    %c0_i32 = arith.constant 0 : i32
    %c0_i32_0 = arith.constant 0 : i32
    return %arg0, %c0_i32 : i32, i32
  }
}

</mosaic_0001>

<bundles_post_ra>
// kernel: tpu_custom_call.1
= control target key start
LH: loop header
LB: loop body
LE: loop exit
PB: predicated region body
PF: predicated region fallthrough
CT: control target
= control target key end

     0   :  { %v276_v2 = vmov 0.0|0.0   ;;  %vm277_vm0 = vmmov 0   ;;  %v278_v4 = vmov 0.0   ;;  %s349_s0 = inlined_call_operand.vmem [shape: f32[8,16], index: 0, kind: input, shape index: {}]   ;;  %s350_s1 = inlined_call_operand.vmem [shape: f32[16,32], index: 1, kind: input, shape index: {}]   ;;  %s351_s2 = inlined_call_operand.vmem [shape: f32[1,32], index: 2, kind: input, shape index: {}]   ;;  %s352_s3 = inlined_call_operand.vmem [shape: f32[32,8], index: 3, kind: input, shape index: {}]   ;;  %s353_s4 = inlined_call_operand.vmem [shape: f32[1,8], index: 4, kind: input, shape index: {}]   ;;  %s354_s5 = inlined_call_operand.hbm [shape: f32[8,8], index: 5, kind: output, shape index: {}]  }
   0x1   :  { %v22_v0 = vld [vmem:[%s350_s1] sm:$0xff]  ;;  %v23_v1 = vld [vmem:[%s350_s1 + $0x8] sm:$0xff]  ;;  %239 = vmatprep.subr.bf16.mxu0 %v276_v2  ;;  %225 = vmatprep.mubr.msk.f32.mxu0 %vm277_vm0, %v278_v4 }
   0x2   :  { %v240_v3 = vpack.c.bf16 %v23_v1, %v22_v0  ;;  %v108_v5 = vld [vmem:[%s352_s3] sm:$0xff]  ;;  %v109_v6 = vld [vmem:[%s352_s3 + $0x8] sm:$0xff]  ;;  %242 = vmatprep.subr.bf16.mxu1 %v276_v2  ;;  %236 = vmatprep.mubr.msk.f32.mxu1 %vm277_vm0, %v278_v4 }
   0x3   :  { %v243_v7 = vpack.c.bf16 %v109_v6, %v108_v5 }
   0x4   :  { %10 = vsyncpa [#allocation3], 0  ;;  %241 = vmatpush3.bf16.msra.mxu0 %v240_v3  ;;  %v21_v8 = vld [vmem:[%s349_s0] sm:$0xff]  ;;  %vm31_vm1 = vcmask 130048   ;;  %v110_v9 = vld [vmem:[%s352_s3 + $0x10] sm:$0xff]  ;;  %vm119_vm3 = vcmask 261120  }
   0x5   :  { %244 = vmatpush3.bf16.msra.mxu1 %v243_v7  ;;  %v111_v10 = vld [vmem:[%s352_s3 + $0x18] sm:$0xff]  ;;  %v209_v12 = vld [vmem:[%s351_s2] ss:$0 sm:$0xff]  ;;  %s279_s9 = smov [#allocation2]   ;;  %vm193_vm4 = vcmask 64512  }
   0x6   :  { %245 = vmatprep.subr.bf16.mxu1 %v276_v2  ;;  %v246_v11 = vpack.c.bf16 %v111_v10, %v110_v9  ;;  %v211_v18 = vld [vmem:[%s353_s4] ss:$0 sm:$0xff]  ;;  %s201_s3 = sshll.u32 %s279_s9, 4  ;;  %s202_s3 = int_to_ptr.vmem [resolvable:$true] %s201_s3 }
   0x7   :  { %226 = vmatmul.mubr.msk.f32.vlgmr.msra.gmra.mrb[0].mxu0 %vm31_vm1, %v21_v8  ;;  %s252_s2 = scalar_lea.vmem %s202_s3, 128  ;;  %p257_p1 = scmp.lt.s32.totalorder %s202_s3, %s202_s3 }
   0x8   :  { %p253_p0 = scmp.ne.s32.totalorder %s202_s3, %s252_s2  ;;  %p258_p2 = scmp.lt.s32.totalorder %s252_s2, %s252_s2 }
   0x9   :  { %247 = vmatpush3.bf16.msra.mxu1 %v246_v11 }
   0xa   :  { %p259_p3 = por %p258_p2, %p257_p1 }
   0xc   :  { %p260_p4 = pnand %p259_p3, %p253_p0 }
  0xda   :  { %v101_v13 = vpop.f32.mrb[0].mxu0 }
  0xdb   :  { %v102_v14 = vadd.f32 %v209_v12, %v101_v13  ;;  %v227_v15 = vpop.f32.mrb[1].mxu0 }
  0xdd   :  { %vm105_vm2 = vcmp.gt.f32.partialorder %v102_v14, 0.0  ;;  %v106_v16 = vmul.f32 0.3, %v102_v14 }
  0xdf   :  { %v107_v17 = vsel %vm105_vm2, %v102_v14, %v106_v16 }
  0xe0   :  { %237 = vmatmul.mubr.msk.f32.vlgmr.msra.gmra.mrb[0].mxu1 %vm119_vm3, %v107_v17 }
 0x1b3   :  { %v189_v19 = vpop.f32.mrb[0].mxu1 }
 0x1b4   :  { %v190_v20 = vadd.f32 %v211_v18, %v189_v19  ;;  %v238_v21 = vpop.f32.mrb[1].mxu1 }
 0x1b6   :  { %194 = vst.msk [vmem:[#allocation2] sm:$0xff] %vm193_vm4, %v190_v20 }
 0x1b7   :  { %263 = shalt.err (!%p260_p4)
}
 0x1b8   :  { %s264_s12 = scalar_lea.hbm %s354_s5, 128 }
 0x1b9   :  { %p265_p5 = scmp.ne.s32.totalorder %s354_s5, %s264_s12  ;;  %p268_p6 = scmp.lt.u32.totalorder %s264_s12, %s354_s5 }
 0x1bb   :  { %p270_p7 = pnand %p268_p6, %p265_p5 }
 0x1bd   :  { %273 = shalt.err (!%p270_p7)
}
 0x1be   :  { %204 = dma.vmem_to_hbm [thread:$0]  %s202_s3, 128, %s354_s5, [#allocation3]  }
 0x1bf   :  { %274 = dma.done.wait [#allocation3], 128  }
 0x1c0   :  { %275 = vsyncadd [#allocation3], 4294967168 }
 0x1c1   :  { %208 = vsyncpa [#allocation3], 1 }

</bundles_post_ra>
